<compile_context>
chip_gen: v7x
topology: tpu7x:2x2x1
jax: 0.10.0
libtpu: 0.0.40
codegen_flags: <defaults>
</compile_context>

<pallas_src>
import functools

import jax
import jax.numpy as jnp
from jax.experimental import pallas as pl
from jax.experimental.pallas import tpu as pltpu

_LN_EPS = 1e-5


# --------------------------------------------------------------------------- #
# Kernel
# --------------------------------------------------------------------------- #
def _adapter_kernel(x_ref, w1_ref, b1_ref, w2_ref, b2_ref, g_ref, beta_ref,
                    o_ref, *, proj_dim):
    """One (row_tile, h_tile) grid step.

    Accumulates the partial Linear2(ReLU(Linear1(x))) contribution of this
    hidden-dim slice into the resident output block, and on the last hidden
    step applies bias + LayerNorm(project_dim) + residual.
    """
    k = pl.program_id(1)

    # Linear1 slice + bias + ReLU.  x is cast to bf16 in-kernel (VPU has slack
    # under the MXU); accumulation stays f32.  Fused so only the bf16 copy of
    # h stays live across the second matmul.
    x = x_ref[...].astype(jnp.bfloat16)
    h = jnp.maximum(
        jnp.dot(x, w1_ref[...], preferred_element_type=jnp.float32)
        + b1_ref[...], 0.0).astype(jnp.bfloat16)
    part = jnp.dot(h, w2_ref[...], preferred_element_type=jnp.float32)

    # Accumulate y directly in the resident f32 output block (no extra scratch).
    @pl.when(k == 0)
    def _():
        o_ref[...] = part

    @pl.when(k > 0)
    def _():
        o_ref[...] = o_ref[...] + part

    # Finalize: bias + LayerNorm over the true project_dim + residual.
    @pl.when(k == pl.num_programs(1) - 1)
    def _():
        y = o_ref[...] + b2_ref[...]          # padded cols of acc/b2 are exactly 0
        p_pad = y.shape[-1]
        inv_p = 1.0 / float(proj_dim)
        mean = jnp.sum(y, axis=-1, keepdims=True) * inv_p
        centered = y - mean
        if p_pad != proj_dim:                 # static branch; skipped when P % 128 == 0
            col = jax.lax.broadcasted_iota(jnp.int32, (1, p_pad), 1)
            centered = centered * (col < proj_dim).astype(jnp.float32)
        var = jnp.sum(centered * centered, axis=-1, keepdims=True) * inv_p
        ln = centered * jax.lax.rsqrt(var + _LN_EPS)
        ln = ln * g_ref[...] + beta_ref[...]  # padded gamma/beta are 0 -> ln pad = 0
        o_ref[...] = (y + ln).astype(o_ref.dtype)


# --------------------------------------------------------------------------- #
# Sizing helpers (generation-aware, computed once)
# --------------------------------------------------------------------------- #
@functools.lru_cache(maxsize=None)
def _vmem_limit_bytes():
    cap = 64 * 1024 * 1024                      # safe v7x floor if the probe fails
    try:
        cap = int(pltpu.get_tpu_info().vmem_capacity_bytes)
    except Exception:                           # hardware-info probe only
        pass
    # Leave headroom for Mosaic internals; cap at 100 MiB (plenty on v5e/v6e,
    # ~56 MiB on v7x's 64 MiB physical VMEM).
    return max(32 * 1024 * 1024, min(cap - 8 * 1024 * 1024, 100 * 1024 * 1024))


def _choose_h_tile(E, H, P_pad):
    """Keep the full hidden dim resident if the double-buffered bf16 weights fit
    comfortably, otherwise stream H in lane-aligned chunks (needed on v7x)."""
    budget = max(32 * 1024 * 1024, _vmem_limit_bytes() - 32 * 1024 * 1024)
    full_db = 4 * (E * H + H * P_pad)           # bf16 weights, double-buffered
    if full_db <= budget:
        return H
    h_tile = 512
    while h_tile > 128 and 4 * (E * h_tile + h_tile * P_pad) > budget:
        h_tile //= 2
    return h_tile


# --------------------------------------------------------------------------- #
# Parameter prep (run ONCE per checkpoint, cache the result)
# --------------------------------------------------------------------------- #
def prepare_visual_adapter_params(w1, b1, w2, b2, ln_gamma, ln_beta, *,
                                  h_tile=None):
    """One-time conversion of adapter parameters: bf16 matmul weights,
    project_dim lane-padded to a multiple of 128, hidden_dim padded to a
    multiple of the chosen h_tile.  Do NOT re-run per forward call."""
    E, H = w1.shape
    P = w2.shape[1]
    P_pad = pl.cdiv(P, 128) * 128               # lane-dense output stores
    if h_tile is None:
        h_tile = _choose_h_tile(E, H, P_pad)
    if h_tile >= H:
        h_tile, H_pad = H, H
    else:
        H_pad = pl.cdiv(H, h_tile) * h_tile
    dh, dp = H_pad - H, P_pad - P

    w1b = jnp.pad(jnp.asarray(w1, jnp.float32), ((0, 0), (0, dh))).astype(jnp.bfloat16)
    w2b = jnp.pad(jnp.asarray(w2, jnp.float32), ((0, dh), (0, dp))).astype(jnp.bfloat16)
    b1r = jnp.pad(jnp.asarray(b1, jnp.float32), (0, dh)).reshape(1, H_pad)
    b2r = jnp.pad(jnp.asarray(b2, jnp.float32), (0, dp)).reshape(1, P_pad)
    gr = jnp.pad(jnp.asarray(ln_gamma, jnp.float32), (0, dp)).reshape(1, P_pad)
    br = jnp.pad(jnp.asarray(ln_beta, jnp.float32), (0, dp)).reshape(1, P_pad)
    return dict(w1=w1b, b1=b1r, w2=w2b, b2=b2r, gamma=gr, beta=br,
                proj_dim=P, h_tile=h_tile)


# --------------------------------------------------------------------------- #
# Forward
# --------------------------------------------------------------------------- #
@functools.partial(jax.jit,
                   static_argnames=("proj_dim", "row_tile", "h_tile", "vmem_limit"))
def _visual_adapter_fwd(x, w1, b1, w2, b2, gamma, beta, *,
                        proj_dim, row_tile, h_tile, vmem_limit):
    B, S, E = x.shape
    R = B * S
    H_pad = w1.shape[1]
    P_pad = w2.shape[1]
    n_h = H_pad // h_tile

    rt = min(row_tile, R)                       # full-row block for small inputs
    n_rows = pl.cdiv(R, rt)                     # partial last block handled by Pallas
    x2 = x.reshape(R, E)                        # metadata-only reshape (no HBM copy)

    kernel = functools.partial(_adapter_kernel, proj_dim=proj_dim)
    out = pl.pallas_call(
        kernel,
        out_shape=jax.ShapeDtypeStruct((R, P_pad), x.dtype),
        grid_spec=pltpu.PrefetchScalarGridSpec(
            num_scalar_prefetch=0,
            grid=(n_rows, n_h),
            in_specs=[
                pl.BlockSpec((rt, E), lambda i, k: (i, 0)),          # x rows (resident over k)
                pl.BlockSpec((E, h_tile), lambda i, k: (0, k)),      # W1 H-slice (streamed)
                pl.BlockSpec((1, h_tile), lambda i, k: (0, k)),      # b1 H-slice
                pl.BlockSpec((h_tile, P_pad), lambda i, k: (k, 0)),  # W2 H-slice (streamed)
                pl.BlockSpec((1, P_pad), lambda i, k: (0, 0)),       # b2
                pl.BlockSpec((1, P_pad), lambda i, k: (0, 0)),       # gamma
                pl.BlockSpec((1, P_pad), lambda i, k: (0, 0)),       # beta
            ],
            out_specs=pl.BlockSpec((rt, P_pad), lambda i, k: (i, 0)),
        ),
        compiler_params=pltpu.CompilerParams(
            dimension_semantics=("parallel", "arbitrary"),
            vmem_limit_bytes=vmem_limit),
    )(x2, w1, b1, w2, b2, gamma, beta)

    if P_pad != proj_dim:                       # no-op slice for production P % 128 == 0
        out = out[:, :proj_dim]
    return out.reshape(B, S, proj_dim)


def visual_adapter(x, params, *, row_tile=256):
    """x: (B, S, encoder_dim) f32; params: output of prepare_visual_adapter_params."""
    return _visual_adapter_fwd(
        x, params["w1"], params["b1"], params["w2"], params["b2"],
        params["gamma"], params["beta"],
        proj_dim=params["proj_dim"], row_tile=row_tile,
        h_tile=params["h_tile"], vmem_limit=_vmem_limit_bytes())


# --------------------------------------------------------------------------- #
# Reference + demo
# --------------------------------------------------------------------------- #
def _reference(x, w1, b1, w2, b2, g, beta):
    h = jnp.maximum(x @ w1 + b1, 0.0)
    y = h @ w2 + b2
    mean = jnp.mean(y, axis=-1, keepdims=True)
    var = jnp.mean((y - mean) ** 2, axis=-1, keepdims=True)
    ln = (y - mean) / jnp.sqrt(var + _LN_EPS) * g + beta
    return y + ln


if __name__ == "__main__":
    # Small shapes consistent with the module's forward:
    #   encoder_dim = 32, project_dim = 16, hidden_dim = project_dim * 4 = 64
    B, S = 2, 8
    encoder_dim, project_dim = 32, 16
    hidden_dim = project_dim * 4

    key = jax.random.PRNGKey(0)
    kx, k1, k2, k3, k4 = jax.random.split(key, 5)

    x = jax.random.normal(kx, (B, S, encoder_dim), dtype=jnp.float32)

    # Deterministic synthetic parameters (no checkpoint load).
    w1 = 0.05 * jax.random.normal(k1, (encoder_dim, hidden_dim), jnp.float32)
    b1 = 0.01 * jax.random.normal(k2, (hidden_dim,), jnp.float32)
    w2 = 0.05 * jax.random.normal(k3, (hidden_dim, project_dim), jnp.float32)
    b2 = 0.01 * jax.random.normal(k4, (project_dim,), jnp.float32)
    ln_gamma = jnp.ones((project_dim,), jnp.float32)   # nn.LayerNorm init
    ln_beta = jnp.zeros((project_dim,), jnp.float32)

    params = prepare_visual_adapter_params(w1, b1, w2, b2, ln_gamma, ln_beta)
    out = visual_adapter(x, params)
    out = jax.block_until_ready(out)

    ref = _reference(x, w1, b1, w2, b2, ln_gamma, ln_beta)
    assert out.shape == (B, S, project_dim)
    # bf16 matmul operands with f32 accumulation -> loosened tolerance.
    assert jnp.allclose(out, ref, atol=3e-2, rtol=3e-2), "mismatch vs reference"

    print("KERNEL_OK")
</pallas_src>

<mosaic_0001>
module attributes {stable_mosaic.version = 11 : i64} {
  func.func @_adapter_kernel(%arg0: i32, %arg1: i32, %arg2: memref<16x32xf32, #tpu.memory_space<vmem>>, %arg3: memref<32x64xbf16, #tpu.memory_space<vmem>>, %arg4: memref<1x64xf32, #tpu.memory_space<vmem>>, %arg5: memref<64x128xbf16, #tpu.memory_space<vmem>>, %arg6: memref<1x128xf32, #tpu.memory_space<vmem>>, %arg7: memref<1x128xf32, #tpu.memory_space<vmem>>, %arg8: memref<1x128xf32, #tpu.memory_space<vmem>>, %arg9: memref<16x128xf32, #tpu.memory_space<vmem>>) attributes {dimension_semantics = [#tpu.dimension_semantics<parallel>, #tpu.dimension_semantics<arbitrary>], iteration_bounds = array<i64: 1, 1>, scalar_prefetch = 0 : i64, scratch_operands = 0 : i64, tpu.core_type = #tpu.core_type<tc>, window_params = [{transform_indices = @transform_0, window_bounds = array<i64: 16, 32>}, {transform_indices = @transform_1, window_bounds = array<i64: 32, 64>}, {transform_indices = @transform_2, window_bounds = array<i64: 1, 64>}, {transform_indices = @transform_3, window_bounds = array<i64: 64, 128>}, {pipeline_mode = #tpu.pipeline_mode<synchronous>, transform_indices = @transform_4, window_bounds = array<i64: 1, 128>}, {pipeline_mode = #tpu.pipeline_mode<synchronous>, transform_indices = @transform_5, window_bounds = array<i64: 1, 128>}, {pipeline_mode = #tpu.pipeline_mode<synchronous>, transform_indices = @transform_6, window_bounds = array<i64: 1, 128>}, {transform_indices = @transform_7, window_bounds = array<i64: 16, 128>}]} {
    %c0 = arith.constant 0 : index
    %c0_0 = arith.constant 0 : index
    %0 = vector.load %arg2[%c0, %c0_0] : memref<16x32xf32, #tpu.memory_space<vmem>>, vector<16x32xf32>
    %1 = arith.truncf %0 : vector<16x32xf32> to vector<16x32xbf16>
    %c0_1 = arith.constant 0 : index
    %c0_2 = arith.constant 0 : index
    %2 = vector.load %arg3[%c0_1, %c0_2] : memref<32x64xbf16, #tpu.memory_space<vmem>>, vector<32x64xbf16>
    %cst = arith.constant dense<0.000000e+00> : vector<16x64xf32>
    %3 = tpu.matmul %1, %2, %cst {dimension_numbers = #tpu.dot_dimension_numbers<[1], [0], [0], [1], [0, 0, 1, 1], [], []>} : vector<16x32xbf16>, vector<32x64xbf16>, vector<16x64xf32> -> vector<16x64xf32>
    %c0_3 = arith.constant 0 : index
    %c0_4 = arith.constant 0 : index
    %4 = vector.load %arg4[%c0_3, %c0_4] : memref<1x64xf32, #tpu.memory_space<vmem>>, vector<1x64xf32>
    %5 = vector.broadcast %4 : vector<1x64xf32> to vector<16x64xf32>
    %6 = arith.addf %3, %5 : vector<16x64xf32>
    %cst_5 = arith.constant 0.000000e+00 : f32
    %7 = vector.broadcast %cst_5 : f32 to vector<16x64xf32>
    %8 = arith.maximumf %6, %7 : vector<16x64xf32>
    %9 = arith.truncf %8 : vector<16x64xf32> to vector<16x64xbf16>
    %c0_6 = arith.constant 0 : index
    %c0_7 = arith.constant 0 : index
    %10 = vector.load %arg5[%c0_6, %c0_7] : memref<64x128xbf16, #tpu.memory_space<vmem>>, vector<64x128xbf16>
    %cst_8 = arith.constant dense<0.000000e+00> : vector<16x128xf32>
    %11 = tpu.matmul %9, %10, %cst_8 {dimension_numbers = #tpu.dot_dimension_numbers<[1], [0], [0], [1], [0, 0, 1, 1], [], []>} : vector<16x64xbf16>, vector<64x128xbf16>, vector<16x128xf32> -> vector<16x128xf32>
    %c0_i32 = arith.constant 0 : i32
    %12 = arith.cmpi eq, %arg1, %c0_i32 : i32
    %13 = arith.extui %12 : i1 to i32
    %c0_i32_9 = arith.constant 0 : i32
    %14 = arith.cmpi ne, %13, %c0_i32_9 : i32
    scf.if %14 {
      %c0_14 = arith.constant 0 : index
      %c0_15 = arith.constant 0 : index
      %21 = vector.load %arg9[%c0_14, %c0_15] : memref<16x128xf32, #tpu.memory_space<vmem>>, vector<16x128xf32>
      tpu.vector_store %arg9[%c0_14, %c0_15], %11 {strides = array<i32>} : memref<16x128xf32, #tpu.memory_space<vmem>>, vector<16x128xf32>,
    } else {
    }
    %c0_i32_10 = arith.constant 0 : i32
    %15 = arith.cmpi sgt, %arg1, %c0_i32_10 : i32
    %16 = arith.extui %15 : i1 to i32
    %c0_i32_11 = arith.constant 0 : i32
    %17 = arith.cmpi ne, %16, %c0_i32_11 : i32
    scf.if %17 {
      %c0_14 = arith.constant 0 : index
      %c0_15 = arith.constant 0 : index
      %21 = vector.load %arg9[%c0_14, %c0_15] : memref<16x128xf32, #tpu.memory_space<vmem>>, vector<16x128xf32>
      %22 = arith.addf %21, %11 : vector<16x128xf32>
      %c0_16 = arith.constant 0 : index
      %c0_17 = arith.constant 0 : index
      %23 = vector.load %arg9[%c0_16, %c0_17] : memref<16x128xf32, #tpu.memory_space<vmem>>, vector<16x128xf32>
      tpu.vector_store %arg9[%c0_16, %c0_17], %22 {strides = array<i32>} : memref<16x128xf32, #tpu.memory_space<vmem>>, vector<16x128xf32>,
    } else {
    }
    %c0_i32_12 = arith.constant 0 : i32
    %18 = arith.cmpi eq, %arg1, %c0_i32_12 : i32
    %19 = arith.extui %18 : i1 to i32
    %c0_i32_13 = arith.constant 0 : i32
    %20 = arith.cmpi ne, %19, %c0_i32_13 : i32
    scf.if %20 {
      %c0_14 = arith.constant 0 : index
      %c0_15 = arith.constant 0 : index
      %21 = vector.load %arg9[%c0_14, %c0_15] : memref<16x128xf32, #tpu.memory_space<vmem>>, vector<16x128xf32>
      %c0_16 = arith.constant 0 : index
      %c0_17 = arith.constant 0 : index
      %22 = vector.load %arg6[%c0_16, %c0_17] : memref<1x128xf32, #tpu.memory_space<vmem>>, vector<1x128xf32>
      %23 = vector.broadcast %22 : vector<1x128xf32> to vector<16x128xf32>
      %24 = arith.addf %21, %23 : vector<16x128xf32>
      %cst_18 = arith.constant dense<0.000000e+00> : vector<16xf32>
      %25 = vector.multi_reduction <add>, %24, %cst_18 [1] : vector<16x128xf32> to vector<16xf32>
      %26 = vector.shape_cast %25 : vector<16xf32> to vector<16x1xf32>
      %cst_19 = arith.constant 6.250000e-02 : f32
      %27 = vector.broadcast %cst_19 : f32 to vector<16x1xf32>
      %28 = arith.mulf %26, %27 : vector<16x1xf32>
      %29 = vector.broadcast %28 : vector<16x1xf32> to vector<16x128xf32>
      %30 = arith.subf %24, %29 : vector<16x128xf32>
      %31 = tpu.iota {dimensions = array<i32: 1>} : vector<1x128xi32>
      %c16_i32 = arith.constant 16 : i32
      %32 = vector.broadcast %c16_i32 : i32 to vector<1x128xi32>
      %33 = arith.cmpi slt, %31, %32 : vector<1x128xi32>
      %34 = arith.extui %33 : vector<1x128xi1> to vector<1x128xi32>
      %35 = arith.sitofp %34 : vector<1x128xi32> to vector<1x128xf32>
      %36 = vector.broadcast %35 : vector<1x128xf32> to vector<16x128xf32>
      %37 = arith.mulf %30, %36 : vector<16x128xf32>
      %38 = arith.mulf %37, %37 : vector<16x128xf32>
      %cst_20 = arith.constant dense<0.000000e+00> : vector<16xf32>
      %39 = vector.multi_reduction <add>, %38, %cst_20 [1] : vector<16x128xf32> to vector<16xf32>
      %40 = vector.shape_cast %39 : vector<16xf32> to vector<16x1xf32>
      %cst_21 = arith.constant 6.250000e-02 : f32
      %41 = vector.broadcast %cst_21 : f32 to vector<16x1xf32>
      %42 = arith.mulf %40, %41 : vector<16x1xf32>
      %cst_22 = arith.constant 9.99999974E-6 : f32
      %43 = vector.broadcast %cst_22 : f32 to vector<16x1xf32>
      %44 = arith.addf %42, %43 : vector<16x1xf32>
      %45 = math.rsqrt %44 : vector<16x1xf32>
      %46 = vector.broadcast %45 : vector<16x1xf32> to vector<16x128xf32>
      %47 = arith.mulf %37, %46 : vector<16x128xf32>
      %c0_23 = arith.constant 0 : index
      %c0_24 = arith.constant 0 : index
      %48 = vector.load %arg7[%c0_23, %c0_24] : memref<1x128xf32, #tpu.memory_space<vmem>>, vector<1x128xf32>
      %49 = vector.broadcast %48 : vector<1x128xf32> to vector<16x128xf32>
      %50 = arith.mulf %47, %49 : vector<16x128xf32>
      %c0_25 = arith.constant 0 : index
      %c0_26 = arith.constant 0 : index
      %51 = vector.load %arg8[%c0_25, %c0_26] : memref<1x128xf32, #tpu.memory_space<vmem>>, vector<1x128xf32>
      %52 = vector.broadcast %51 : vector<1x128xf32> to vector<16x128xf32>
      %53 = arith.addf %50, %52 : vector<16x128xf32>
      %54 = arith.addf %24, %53 : vector<16x128xf32>
      %c0_27 = arith.constant 0 : index
      %c0_28 = arith.constant 0 : index
      %55 = vector.load %arg9[%c0_27, %c0_28] : memref<16x128xf32, #tpu.memory_space<vmem>>, vector<16x128xf32>
      tpu.vector_store %arg9[%c0_27, %c0_28], %54 {strides = array<i32>} : memref<16x128xf32, #tpu.memory_space<vmem>>, vector<16x128xf32>,
    } else {
    }
    return
  }
  func.func @transform_0(%arg0: i32, %arg1: i32) -> (i32, i32) {
    %c0_i32 = arith.constant 0 : i32
    %c0_i32_0 = arith.constant 0 : i32
    return %arg0, %c0_i32 : i32, i32
  }
  func.func @transform_1(%arg0: i32, %arg1: i32) -> (i32, i32) {
    %c0_i32 = arith.constant 0 : i32
    %c0_i32_0 = arith.constant 0 : i32
    return %c0_i32, %arg1 : i32, i32
  }
  func.func @transform_2(%arg0: i32, %arg1: i32) -> (i32, i32) {
    %c0_i32 = arith.constant 0 : i32
    %c0_i32_0 = arith.constant 0 : i32
    return %c0_i32, %arg1 : i32, i32
  }
  func.func @transform_3(%arg0: i32, %arg1: i32) -> (i32, i32) {
    %c0_i32 = arith.constant 0 : i32
    %c0_i32_0 = arith.constant 0 : i32
    return %arg1, %c0_i32 : i32, i32
  }
  func.func @transform_4(%arg0: i32, %arg1: i32) -> (i32, i32) {
    %c0_i32 = arith.constant 0 : i32
    %c0_i32_0 = arith.constant 0 : i32
    %c0_i32_1 = arith.constant 0 : i32
    return %c0_i32, %c0_i32_0 : i32, i32
  }
  func.func @transform_5(%arg0: i32, %arg1: i32) -> (i32, i32) {
    %c0_i32 = arith.constant 0 : i32
    %c0_i32_0 = arith.constant 0 : i32
    %c0_i32_1 = arith.constant 0 : i32
    return %c0_i32, %c0_i32_0 : i32, i32
  }
  func.func @transform_6(%arg0: i32, %arg1: i32) -> (i32, i32) {
    %c0_i32 = arith.constant 0 : i32
    %c0_i32_0 = arith.constant 0 : i32
    %c0_i32_1 = arith.constant 0 : i32
    return %c0_i32, %c0_i32_0 : i32, i32
  }
  func.func @transform_7(%arg0: i32, %arg1: i32) -> (i32, i32) {
    %c0_i32 = arith.constant 0 : i32
    %c0_i32_0 = arith.constant 0 : i32
    return %arg0, %c0_i32 : i32, i32
  }
}

</mosaic_0001>

<bundles_post_ra>
// kernel: _visual_adapter_fwd.1
= control target key start
LH: loop header
LB: loop body
LE: loop exit
PB: predicated region body
PF: predicated region fallthrough
CT: control target
= control target key end

     0   :  { %12 = vsyncpa [#allocation3], 0  ;;  %s545_s0 = inlined_call_operand.hbm [shape: f32[16,32], index: 0, kind: input, shape index: {}]   ;;  %s546_s1 = inlined_call_operand.hbm [shape: bf16[32,64], index: 1, kind: input, shape index: {}]   ;;  %s547_s2 = inlined_call_operand.vmem [shape: f32[1,64], index: 2, kind: input, shape index: {}]   ;;  %s548_s3 = inlined_call_operand.hbm [shape: bf16[64,128], index: 3, kind: input, shape index: {}]   ;;  %s549_s4 = inlined_call_operand.vmem [shape: f32[1,128], index: 4, kind: input, shape index: {}]   ;;  %s550_s5 = inlined_call_operand.vmem [shape: f32[1,128], index: 5, kind: input, shape index: {}]   ;;  %s551_s6 = inlined_call_operand.vmem [shape: f32[1,128], index: 6, kind: input, shape index: {}]   ;;  %s552_s7 = inlined_call_operand.vmem [shape: f32[16,128], index: 7, kind: output, shape index: {}]  }
   0x1   :  { %13 = vsyncpa [#allocation5], 0  ;;  %s436_s24 = smov [#allocation4]   ;;  %s366_s28 = scalar_lea.hbm %s546_s1, 256 }
   0x2   :  { %s31_s25 = sshll.u32 %s436_s24, 4  ;;  %p367_p0 = scmp.ne.s32.totalorder %s546_s1, %s366_s28  ;;  %s32_s25 = int_to_ptr.vmem [resolvable:$true] %s31_s25 }
   0x3   :  { %p370_p1 = scmp.lt.u32.totalorder %s366_s28, %s546_s1 }
   0x5   :  { %p372_p2 = pnand %p370_p1, %p367_p0 }
   0x7   :  { %375 = shalt.err (!%p372_p2)
}
   0x8   :  { %s376_s10 = scalar_lea.vmem %s32_s25, 256  ;;  %p381_p4 = scmp.lt.s32.totalorder %s32_s25, %s32_s25 }
   0x9   :  { %p377_p3 = scmp.ne.s32.totalorder %s32_s25, %s376_s10  ;;  %p382_p5 = scmp.lt.s32.totalorder %s376_s10, %s376_s10 }
   0xb   :  { %p383_p6 = por %p382_p5, %p381_p4 }
   0xd   :  { %p384_p7 = pnand %p383_p6, %p377_p3 }
   0xf   :  { %387 = shalt.err (!%p384_p7)
}
  0x10   :  { %s437_s11 = smov 64   ;;  %s438_s12 = smov 4  }
  0x11   :  { %37 = dma.hbm_to_vmem [thread:$0]  %s546_s1, 256, %s32_s25, [#allocation5], %s437_s11, %s437_s11, %s438_s12  }
  0x12   :  { %s439_s15 = smov [#allocation2]   ;;  %s388_s19 = scalar_lea.hbm %s545_s0, 256 }
  0x13   :  { %s19_s16 = sshll.u32 %s439_s15, 4  ;;  %p389_p8 = scmp.ne.s32.totalorder %s545_s0, %s388_s19  ;;  %s20_s16 = int_to_ptr.vmem [resolvable:$true] %s19_s16 }
  0x14   :  { %p392_p9 = scmp.lt.u32.totalorder %s388_s19, %s545_s0 }
  0x16   :  { %p394_p10 = pnand %p392_p9, %p389_p8 }
  0x18   :  { %397 = shalt.err (!%p394_p10)
}
  0x19   :  { %s398_s24 = scalar_lea.vmem %s20_s16, 256  ;;  %p403_p12 = scmp.lt.s32.totalorder %s20_s16, %s20_s16 }
  0x1a   :  { %p399_p11 = scmp.ne.s32.totalorder %s20_s16, %s398_s24  ;;  %p404_p13 = scmp.lt.s32.totalorder %s398_s24, %s398_s24 }
  0x1c   :  { %p405_p0 = por %p404_p13, %p403_p12 }
  0x1e   :  { %p406_p1 = pnand %p405_p0, %p399_p11 }
  0x20   :  { %409 = shalt.err (!%p406_p1)
}
  0x21   :  { %s440_s1 = smov 128   ;;  %s441_s25 = smov 8  }
  0x22   :  { %25 = dma.hbm_to_vmem [thread:$0]  %s545_s0, 256, %s20_s16, [#allocation3], %s440_s1, %s440_s1, %s441_s25  }
  0x23   :  { %s442_s28 = smov [#allocation6]   ;;  %s410_s9 = scalar_lea.hbm %s548_s3, 512 }
  0x24   :  { %s45_s29 = sshll.u32 %s442_s28, 4  ;;  %p411_p2 = scmp.ne.s32.totalorder %s548_s3, %s410_s9  ;;  %s46_s29 = int_to_ptr.vmem [resolvable:$true] %s45_s29 }
  0x25   :  { %p414_p3 = scmp.lt.u32.totalorder %s410_s9, %s548_s3 }
  0x27   :  { %p416_p4 = pnand %p414_p3, %p411_p2 }
  0x29   :  { %419 = shalt.err (!%p416_p4)
}
  0x2a   :  { %s420_s17 = scalar_lea.vmem %s46_s29, 512  ;;  %p425_p6 = scmp.lt.s32.totalorder %s46_s29, %s46_s29 }
  0x2b   :  { %p421_p5 = scmp.ne.s32.totalorder %s46_s29, %s420_s17  ;;  %p426_p7 = scmp.lt.s32.totalorder %s420_s17, %s420_s17 }
  0x2d   :  { %p427_p8 = por %p426_p7, %p425_p6 }
  0x2f   :  { %p428_p9 = pnand %p427_p8, %p421_p5 }
  0x31   :  { %431 = shalt.err (!%p428_p9)
}
  0x32   :  { %51 = dma.hbm_to_vmem [thread:$0]  %s548_s3, 512, %s46_s29, [#allocation5], %s437_s11, %s437_s11, %s438_s12  }
  0x33   :  { %432 = dma.done.wait [#allocation3], 256  }
  0x34   :  { %433 = vsyncadd [#allocation3], 4294967040 }
  0x35   :  { %434 = dma.done.wait [#allocation5], 768  }
  0x36   :  { %435 = vsyncadd [#allocation5], 4294966528  ;;  %v443_v0 = vmov 0.0   ;;  %vm444_vm0 = vmmov 0   ;;  %v356_v1 = vld [vmem:[#allocation4] sm:$0xff]   ;;  %v357_v2 = vld [vmem:[#allocation4 + $0x8] sm:$0xff]   ;;  %v257_v27 = vlaneseq }
  0x37   :  { %327 = vmatprep.subr.bf16.mxu0 %v443_v0  ;;  %331 = vmatprep.mubr.msk.bf16.mxu0 %vm444_vm0, %v443_v0  ;;  %v68_v3 = vld [vmem:[#allocation2] sm:$0xff]  ;;  %v69_v4 = vld [vmem:[#allocation2 + $0x8] sm:$0xff]  ;;  %vm94_vm1 = vcmask 261120   ;;  %v360_v8 = vld [vmem:[#allocation6 + $0x10] sm:$0xff]   ;;  %vm174_vm2 = vcmask 523264  }
  0x38   :  { %335 = vmatprep.subr.bf16.mxu1 %v443_v0  ;;  %343 = vmatprep.mubr.msk.bf16.mxu1 %vm444_vm0, %v443_v0  ;;  %v358_v5 = vld [vmem:[#allocation6] sm:$0xff]   ;;  %v359_v6 = vld [vmem:[#allocation6 + $0x8] sm:$0xff]   ;;  %v70_v7 = vpack.c.bf16 %v69_v4, %v68_v3  ;;  %v361_v9 = vld [vmem:[#allocation6 + $0x18] sm:$0xff]   ;;  %v258_v28 = vand.u32 127, %v257_v27 }
  0x39   :  { %328 = vmatpush3.bf16.msra.mxu0 %v356_v1  ;;  %336 = vmatpush3.bf16.msra.mxu1 %v358_v5  ;;  %v306_v10 = vld [vmem:[%s547_s2] ss:$0 sm:$0xff] }
  0x3a   :  { %329 = vmatprep.subr.bf16.mxu0 %v443_v0  ;;  %337 = vmatprep.subr.bf16.mxu1 %v443_v0  ;;  %v315_v20 = vld [vmem:[%s549_s4] ss:$0 sm:$0xff]  ;;  %vm259_vm3 = vcmp.lt.s32.totalorder %v258_v28, 16 }
  0x3b   :  { %v316_v31 = vsel %vm259_vm3, 1.0, %v443_v0  ;;  %v317_v47 = vld [vmem:[%s550_s5] ss:$0 sm:$0xff] }
  0x3c   :  { %v318_v49 = vld [vmem:[%s551_s6] ss:$0 sm:$0xff] }
  0x3d   :  { %330 = vmatpush3.bf16.msra.mxu0 %v357_v2  ;;  %338 = vmatpush3.bf16.msra.mxu1 %v359_v6 }
  0x3e   :  { %339 = vmatprep.subr.bf16.mxu1 %v443_v0 }
  0x40   :  { %332 = vmatmul.mubr.msk.bf16.vlgmr.msra.gmra.mrb[0].mxu0 %vm94_vm1, %v70_v7 }
  0x41   :  { %340 = vmatpush3.bf16.msra.mxu1 %v360_v8 }
  0x42   :  { %341 = vmatprep.subr.bf16.mxu1 %v443_v0 }
  0x45   :  { %342 = vmatpush3.bf16.msra.mxu1 %v361_v9 }
 0x113   :  { %v132_v11 = vpop.f32.mrb[0].mxu0 }
 0x114   :  { %v133_v12 = vadd.f32 %v306_v10, %v132_v11  ;;  %v333_v13 = vpop.f32.mrb[1].mxu0 }
 0x115   :  { %v135_v14 = vpop.f32.mrb[2].mxu0 }
 0x116   :  { %v136_v15 = vadd.f32 %v306_v10, %v135_v14  ;;  %v334_v16 = vpop.f32.mrb[3].mxu0  ;;  %v139_v17 = vmax.f32 %v133_v12, 0.0 }
 0x118   :  { %v140_v18 = vmax.f32 %v136_v15, 0.0 }
 0x11a   :  { %v141_v19 = vpack.c.bf16 %v140_v18, %v139_v17 }
 0x11c   :  { %344 = vmatmul.mubr.msk.bf16.vlgmr.msra.gmra.mrb[0].mxu1 %vm174_vm2, %v141_v19 }
 0x1ef   :  { %v212_v21 = vpop.f32.mrb[0].mxu1 }
 0x1f0   :  { %v345_v22 = vpop.f32.mrb[1].mxu1  ;;  %v247_v23 = vadd.f32 %v315_v20, %v212_v21 }
 0x1f1   :  { %v215_v24 = vpop.f32.mrb[2].mxu1 }
 0x1f2   :  { %v346_v25 = vpop.f32.mrb[3].mxu1  ;;  %249 = vadd.xlane.f32.xlu0 %v247_v23  ;;  %v248_v26 = vadd.f32 %v315_v20, %v215_v24 }
 0x1f6   :  { %251 = vadd.xlane.f32.xlu0 %v248_v26 }
 0x27f   :  { %v250_v29 = vpop.xlane.xlu0 %249 }
 0x280   :  { %v253_v30 = vmul.f32 0.0625, %v250_v29 }
 0x282   :  { %v255_v32 = vsub.f32 %v247_v23, %v253_v30 }
 0x283   :  { %v252_v33 = vpop.xlane.xlu0 %251 }
 0x284   :  { %v254_v34 = vmul.f32 0.0625, %v252_v33  ;;  %v262_v35 = vmul.f32 %v316_v31, %v255_v32 }
 0x286   :  { %v256_v36 = vsub.f32 %v248_v26, %v254_v34  ;;  %v264_v37 = vmul.f32 %v262_v35, %v262_v35 }
 0x288   :  { %266 = vadd.xlane.f32.xlu1 %v264_v37  ;;  %v263_v38 = vmul.f32 %v316_v31, %v256_v36 }
 0x28a   :  { %v265_v39 = vmul.f32 %v263_v38, %v263_v38 }
 0x28c   :  { %268 = vadd.xlane.f32.xlu1 %v265_v39 }
 0x315   :  { %v267_v40 = vpop.xlane.xlu1 %266 }
 0x316   :  { %v270_v41 = vmul.f32 0.0625, %v267_v40 }
 0x318   :  { %v272_v42 = vadd.f32 1e-05, %v270_v41 }
 0x319   :  { %v269_v43 = vpop.xlane.xlu1 %268 }
 0x31a   :  { %362 = vrsqrt.f32 %v272_v42  ;;  %v271_v44 = vmul.f32 0.0625, %v269_v43 }
 0x31c   :  { %v273_v45 = vadd.f32 1e-05, %v271_v44 }
 0x31e   :  { %364 = vrsqrt.f32 %v273_v45 }
 0x324   :  { %v363_v46 = vpop.eup %362 }
 0x325   :  { %v276_v48 = vmul.f32 %v363_v46, %v262_v35 }
 0x327   :  { %v285_v50 = vmul.f32 %v317_v47, %v276_v48 }
 0x328   :  { %v365_v51 = vpop.eup %364 }
 0x329   :  { %v294_v52 = vadd.f32 %v318_v49, %v285_v50  ;;  %v277_v53 = vmul.f32 %v365_v51, %v263_v38 }
 0x32b   :  { %v296_v54 = vadd.f32 %v294_v52, %v247_v23  ;;  %v286_v55 = vmul.f32 %v317_v47, %v277_v53 }
 0x32d   :  { %298 = vst [vmem:[%s552_s7] sm:$0xff] %v296_v54  ;;  %v295_v56 = vadd.f32 %v318_v49, %v286_v55 }
 0x32f   :  { %v297_v57 = vadd.f32 %v295_v56, %v248_v26 }
 0x331   :  { %299 = vst [vmem:[%s552_s7 + $0x8] sm:$0xff] %v297_v57 }
 0x332   :  { %304 = vsyncpa [#allocation3], 1 }
 0x333   :  { %305 = vsyncpa [#allocation5], 1 }

</bundles_post_ra>
